<compile_context>
chip_gen: v7x
topology: tpu7x:2x2x1
jax: 0.10.0
libtpu: 0.0.40
codegen_flags: <defaults>
</compile_context>

<pallas_src>
import functools

import jax
import jax.numpy as jnp
from jax import lax
from jax.experimental import pallas as pl
from jax.experimental.pallas import tpu as pltpu


_LANE_WIDE = 512
_LANE_NARROW = 128
_TARGET_TILE_BYTES = 4 * 1024 * 1024         # f32-equivalent bytes per tile
_FAST_PATH_MAX_F32_BYTES = 8 * 1024 * 1024   # single-pass if f32 footprint <= this
_VMEM_LIMIT_BYTES = 48 * 1024 * 1024         # < v7x 64 MiB physical VMEM


def _round_up(n, m):
    return ((n + m - 1) // m) * m


def _f32_vmem_footprint(shape):
    """Rough f32 VMEM footprint of an array laid out as (sublanes, lanes)."""
    if len(shape) == 0:
        return 8 * 128 * 4
    minor = max(int(shape[-1]), 1)
    major = 1
    for d in shape[:-1]:
        major *= int(d)
    major = max(major, 1)
    return _round_up(major, 8) * _round_up(minor, 128) * 4


# ---------------------------------------------------------------- kernels ----

def _fused_kernel(x_ref, o_ref):
    """Single-pass path: whole (native-dtype) array resident in VMEM."""
    x = x_ref[...]
    x_min = jnp.min(x).astype(jnp.float32)
    x_max = jnp.max(x).astype(jnp.float32)
    # NaN for constant input (0/0), matching the PyTorch formula.
    inv_range = 1.0 / (x_max - x_min)
    o_ref[...] = ((x.astype(jnp.float32) - x_min) * inv_range).astype(o_ref.dtype)


def _make_minmax_kernel(*, half, num_tiles, tile_rows, lane, rows, last_cols,
                        mask_mode):
    """Phase 1: per-core partial [min, max] with vreg-resident accumulators."""

    def kernel(x_ref, mm_ref, amin_ref, amax_ref):
        i = pl.program_id(1)

        @pl.when(i == 0)
        def _():
            amin_ref[...] = jnp.full(amin_ref.shape, jnp.inf, jnp.float32)
            amax_ref[...] = jnp.full(amax_ref.shape, -jnp.inf, jnp.float32)

        x = x_ref[...]
        if mask_mode is None:
            # Fully tile-aligned: every element of every block is valid.
            x_lo, x_hi = x, x
        else:
            c = pl.program_id(0)
            tile_idx = jnp.minimum(c * half + i, num_tiles - 1)
            row = tile_idx * tile_rows + lax.broadcasted_iota(
                jnp.int32, (tile_rows, lane), 0)
            if mask_mode == "rows":
                valid = row < rows
            else:  # "elements": last (padded) row is valid only up to last_cols
                col = lax.broadcasted_iota(jnp.int32, (tile_rows, lane), 1)
                valid = (row < rows - 1) | ((row == rows - 1) & (col < last_cols))
            x_lo = jnp.where(valid, x, jnp.inf)
            x_hi = jnp.where(valid, x, -jnp.inf)

        # Pure elementwise (VPU) accumulate; fully hidden under the input DMA.
        amin_ref[...] = jnp.minimum(amin_ref[...], x_lo)
        amax_ref[...] = jnp.maximum(amax_ref[...], x_hi)

        # Scalarize (XLU reduce + store) only once, on this core's last step.
        @pl.when(i == half - 1)
        def _():
            mm_ref[0, 0] = jnp.full((8, 128), jnp.min(amin_ref[...]), jnp.float32)
            mm_ref[0, 1] = jnp.full((8, 128), jnp.max(amax_ref[...]), jnp.float32)

    return kernel


def _normalize_kernel(mm_ref, x_ref, o_ref):
    """Phase 2: combine per-core partials (scalar work) + fused normalize."""
    x_min = jnp.minimum(jnp.min(mm_ref[0, 0]), jnp.min(mm_ref[1, 0]))
    x_max = jnp.maximum(jnp.max(mm_ref[0, 1]), jnp.max(mm_ref[1, 1]))
    inv_range = 1.0 / (x_max - x_min)
    o_ref[...] = ((x_ref[...].astype(jnp.float32) - x_min)
                  * inv_range).astype(o_ref.dtype)


# ---------------------------------------------------------------- wrapper ----

def _two_pass(x2d, total, out_dtype, orig_shape, lane, rows, tile_rows,
              num_tiles):
    half = pl.cdiv(num_tiles, 2)
    last_cols = total - (rows - 1) * lane
    if rows * lane != total:
        mask_mode = "elements"      # padded flat view: mask to element granularity
    elif num_tiles * tile_rows != rows:
        mask_mode = "rows"          # partial last tile: mask OOB rows only
    else:
        mask_mode = None            # fully aligned: no masking at all

    def x_index_map(c, i):
        # Clamp: if num_tiles is odd the second core re-reduces the last tile,
        # which is harmless (min/max are idempotent).
        return (jnp.minimum(c * half + i, num_tiles - 1), 0)

    minmax_kernel = _make_minmax_kernel(
        half=half, num_tiles=num_tiles, tile_rows=tile_rows, lane=lane,
        rows=rows, last_cols=last_cols, mask_mode=mask_mode)

    # ---- phase 1: per-core partial [min, max] ----
    partials = pl.pallas_call(
        minmax_kernel,
        out_shape=jax.ShapeDtypeStruct((2, 2, 8, 128), jnp.float32),
        grid=(2, half),
        in_specs=[pl.BlockSpec((tile_rows, lane), x_index_map)],
        out_specs=pl.BlockSpec((1, 2, 8, 128), lambda c, i: (c, 0, 0, 0)),
        scratch_shapes=[pltpu.VMEM((tile_rows, lane), jnp.float32),
                        pltpu.VMEM((tile_rows, lane), jnp.float32)],
        compiler_params=pltpu.CompilerParams(
            dimension_semantics=("parallel", "arbitrary"),
            vmem_limit_bytes=_VMEM_LIMIT_BYTES),
    )(x2d)

    # ---- phase 2: megacore-parallel fused normalize, native-dtype output ----
    out2d = pl.pallas_call(
        _normalize_kernel,
        out_shape=jax.ShapeDtypeStruct((rows, lane), out_dtype),
        grid=(num_tiles,),
        in_specs=[pl.BlockSpec(memory_space=pltpu.MemorySpace.VMEM),  # partials (8 KiB)
                  pl.BlockSpec((tile_rows, lane), lambda i: (i, 0))],
        out_specs=pl.BlockSpec((tile_rows, lane), lambda i: (i, 0)),
        compiler_params=pltpu.CompilerParams(
            dimension_semantics=("parallel",),
            vmem_limit_bytes=_VMEM_LIMIT_BYTES),
    )(partials, x2d)

    if rows * lane != total:
        # Ragged fallback only: one small slice copy.
        # TODO(synk): could be removed with a 1-D output view, but 1-D TPU
        # layouts waste 7/8 of each vreg, so keep the 2-D lane-dense store.
        return out2d.reshape(-1)[:total].reshape(orig_shape)
    return out2d.reshape(orig_shape)


def _wave_norm_impl(x, single_pass_max_bytes):
    orig_shape = x.shape
    total = x.size
    if total == 0:
        return x

    if not jnp.issubdtype(x.dtype, jnp.floating):
        # torch's true division returns float for integer inputs.
        x = x.astype(jnp.float32)
    out_dtype = x.dtype
    itemsize = jnp.dtype(x.dtype).itemsize

    # ---- static layout selection ----
    if total % _LANE_NARROW == 0:
        lane = _LANE_WIDE if total % _LANE_WIDE == 0 else _LANE_NARROW
        aligned = True
    else:
        lane = _LANE_WIDE if total >= _LANE_WIDE * 64 else _LANE_NARROW
        aligned = False
    rows = pl.cdiv(total, lane)

    # ---- single-pass fast path: whole array (native dtype) in VMEM ----
    view = x.reshape(rows, lane) if aligned else (
        x if x.ndim >= 2 else x.reshape(1, total))
    if _f32_vmem_footprint(view.shape) <= single_pass_max_bytes:
        out = pl.pallas_call(
            _fused_kernel,
            out_shape=jax.ShapeDtypeStruct(view.shape, out_dtype),
            in_specs=[pl.BlockSpec(memory_space=pltpu.MemorySpace.VMEM)],
            out_specs=pl.BlockSpec(memory_space=pltpu.MemorySpace.VMEM),
            compiler_params=pltpu.CompilerParams(
                vmem_limit_bytes=_VMEM_LIMIT_BYTES),
        )(view)
        return out.reshape(orig_shape)

    # ---- two-pass tiled path ----
    # Row-tile floor respects packed tiling: f32 -> 8, bf16/f16 -> 16, int8 -> 32.
    sub_min = max(8, 32 // max(itemsize, 1))
    if rows <= sub_min:
        tile_rows = rows                      # full-dim block is always legal
    else:
        max_rows = max(sub_min, _TARGET_TILE_BYTES // (lane * 4))
        tile_rows = min(max_rows, 1 << (rows.bit_length() - 1))
    num_tiles = pl.cdiv(rows, tile_rows)

    flat = x.reshape(-1)                      # free (metadata only)
    if rows * lane != total:
        # Ragged only: pad flat view by < lane elements (zeros, masked in phase 1).
        flat = jnp.pad(flat, (0, rows * lane - total))
    x2d = flat.reshape(rows, lane)

    return _two_pass(x2d, total, out_dtype, orig_shape, lane, rows, tile_rows,
                     num_tiles)


@functools.partial(jax.jit, static_argnames=("single_pass_max_bytes",))
def wave_norm(x, *, single_pass_max_bytes=_FAST_PATH_MAX_F32_BYTES):
    return _wave_norm_impl(x, single_pass_max_bytes)


# -------------------------------------------------------------- reference ----

def wave_norm_reference(x):
    x_min = jnp.min(x)
    x_max = jnp.max(x)
    return (x - x_min) / (x_max - x_min)


if __name__ == "__main__":
    # 1) Small lane-aligned tensor -> single-pass VMEM fast path.
    x = jax.random.normal(jax.random.PRNGKey(0), (2, 4, 16, 16),
                          dtype=jnp.float32)
    ref = wave_norm_reference(x)
    out = jax.block_until_ready(wave_norm(x))
    assert out.shape == x.shape and out.dtype == x.dtype
    assert jnp.allclose(out, ref, rtol=1e-5, atol=1e-5), float(
        jnp.max(jnp.abs(out - ref)))

    # 2) Same tensor forced through the tiled two-pass path.
    out2 = jax.block_until_ready(wave_norm(x, single_pass_max_bytes=0))
    assert jnp.allclose(out2, ref, rtol=1e-5, atol=1e-5), float(
        jnp.max(jnp.abs(out2 - ref)))

    # 3) Ragged size, forced two-pass (exercises padded flat view + element mask).
    x3 = jax.random.uniform(jax.random.PRNGKey(1), (3, 5, 7), jnp.float32,
                            -3.0, 5.0)
    ref3 = wave_norm_reference(x3)
    out3 = jax.block_until_ready(wave_norm(x3, single_pass_max_bytes=0))
    assert out3.shape == x3.shape and out3.dtype == x3.dtype
    assert jnp.allclose(out3, ref3, rtol=1e-5, atol=1e-5), float(
        jnp.max(jnp.abs(out3 - ref3)))

    # 4) Ragged size through the fast path (original-shape VMEM view).
    out4 = jax.block_until_ready(wave_norm(x3))
    assert jnp.allclose(out4, ref3, rtol=1e-5, atol=1e-5), float(
        jnp.max(jnp.abs(out4 - ref3)))

    # 5) Multi-tile two-pass with a partial last tile (row mask + 2-core split).
    x5 = jax.random.normal(jax.random.PRNGKey(2), (520, 512), dtype=jnp.float32)
    ref5 = wave_norm_reference(x5)
    out5 = jax.block_until_ready(wave_norm(x5, single_pass_max_bytes=0))
    assert jnp.allclose(out5, ref5, rtol=1e-5, atol=1e-5), float(
        jnp.max(jnp.abs(out5 - ref5)))

    # 6) Native bf16 streaming (no f32 round trips), forced two-pass.
    xb = jax.random.normal(jax.random.PRNGKey(3), (4, 8, 128),
                           dtype=jnp.bfloat16)
    refb = wave_norm_reference(xb.astype(jnp.float32))
    outb = jax.block_until_ready(wave_norm(xb, single_pass_max_bytes=0))
    assert outb.dtype == jnp.bfloat16 and outb.shape == xb.shape
    assert jnp.allclose(outb.astype(jnp.float32), refb, rtol=2e-2, atol=2e-2)

    print("KERNEL_OK")
</pallas_src>

<mosaic_0001>
module attributes {stable_mosaic.version = 11 : i64} {
  func.func @_fused_kernel(%arg0: memref<4x512xf32, #tpu.memory_space<vmem>>, %arg1: memref<4x512xf32, #tpu.memory_space<vmem>>) attributes {dimension_semantics = [], scalar_prefetch = 0 : i64, scratch_operands = 0 : i64, tpu.core_type = #tpu.core_type<tc>} {
    %c0 = arith.constant 0 : index
    %c0_0 = arith.constant 0 : index
    %0 = vector.load %arg0[%c0, %c0_0] : memref<4x512xf32, #tpu.memory_space<vmem>>, vector<4x512xf32>
    %1 = vector.shape_cast %0 : vector<4x512xf32> to vector<1x4x512xf32>
    %cst = arith.constant dense<0x7F800000> : vector<1xf32>
    %2 = vector.multi_reduction <minimumf>, %1, %cst [1, 2] : vector<1x4x512xf32> to vector<1xf32>
    %3 = vector.shape_cast %2 : vector<1xf32> to vector<1x1x1xf32>
    %4 = vector.extract %3[0, 0, 0] : f32 from vector<1x1x1xf32>
    %5 = vector.shape_cast %0 : vector<4x512xf32> to vector<1x4x512xf32>
    %cst_1 = arith.constant dense<0xFF800000> : vector<1xf32>
    %6 = vector.multi_reduction <maximumf>, %5, %cst_1 [1, 2] : vector<1x4x512xf32> to vector<1xf32>
    %7 = vector.shape_cast %6 : vector<1xf32> to vector<1x1x1xf32>
    %8 = vector.extract %7[0, 0, 0] : f32 from vector<1x1x1xf32>
    %9 = arith.subf %8, %4 : f32
    %cst_2 = arith.constant 1.000000e+00 : f32
    %10 = arith.divf %cst_2, %9 : f32
    %11 = vector.broadcast %4 : f32 to vector<4x512xf32>
    %12 = arith.subf %0, %11 : vector<4x512xf32>
    %13 = vector.broadcast %10 : f32 to vector<4x512xf32>
    %14 = arith.mulf %12, %13 : vector<4x512xf32>
    %c0_3 = arith.constant 0 : index
    %c0_4 = arith.constant 0 : index
    %15 = vector.load %arg1[%c0_3, %c0_4] : memref<4x512xf32, #tpu.memory_space<vmem>>, vector<4x512xf32>
    tpu.vector_store %arg1[%c0_3, %c0_4], %14 {strides = array<i32>} : memref<4x512xf32, #tpu.memory_space<vmem>>, vector<4x512xf32>,
    return
  }
}

</mosaic_0001>

<bundles_post_ra>
// kernel: wave_norm.1
= control target key start
LH: loop header
LB: loop body
LE: loop exit
PB: predicated region body
PF: predicated region fallthrough
CT: control target
= control target key end

     0   :  { %vm16_vm0 = vcmask 1043456   ;;  %s97_s0 = inlined_call_operand.vmem [shape: f32[4,512], index: 0, kind: input, shape index: {}]   ;;  %s98_s1 = inlined_call_operand.vmem [shape: f32[4,512], index: 1, kind: output, shape index: {}]  }
   0x1   :  { %v8_v0 = vld [vmem:[%s97_s0] sm:$0xff]  ;;  %v9_v1 = vld [vmem:[%s97_s0 + $0x8] sm:$0xff] }
   0x2   :  { %v12_v2 = vcombine.high %v8_v0, %v8_v0  ;;  %v13_v3 = vcombine.high %v9_v1, %v9_v1  ;;  %v17_v4 = vsel %vm16_vm0, %v8_v0, inf  ;;  %v19_v5 = vsel %vm16_vm0, %v9_v1, inf }
   0x3   :  { %v33_v6 = vsel %vm16_vm0, %v8_v0, -inf  ;;  %v35_v7 = vsel %vm16_vm0, %v9_v1, -inf }
   0x4   :  { %v18_v8 = vsel %vm16_vm0, %v12_v2, inf  ;;  %v20_v9 = vsel %vm16_vm0, %v13_v3, inf  ;;  %v34_v10 = vsel %vm16_vm0, %v12_v2, -inf  ;;  %v36_v11 = vsel %vm16_vm0, %v13_v3, -inf }
   0x5   :  { %v21_v12 = vmin.f32 %v17_v4, %v18_v8  ;;  %v22_v13 = vmin.f32 %v19_v5, %v20_v9  ;;  %v37_v14 = vmax.f32 %v33_v6, %v34_v10  ;;  %v38_v15 = vmax.f32 %v35_v7, %v36_v11 }
   0x7   :  { %v23_v16 = vmin.f32 %v21_v12, %v22_v13  ;;  %v39_v17 = vmax.f32 %v37_v14, %v38_v15 }
   0x9   :  { %24 = vmin.xlane.f32.xlu0 %v23_v16 }
   0xd   :  { %40 = vmax.xlane.f32.xlu0 %v39_v17 }
  0x96   :  { %v25_v18 = vpop.xlane.xlu0 %24 }
  0x97   :  { %v26_v19 = vrot.slane %v25_v18, 4 }
  0x99   :  { %v27_v20 = vmin.f32 %v25_v18, %v26_v19 }
  0x9a   :  { %v41_v21 = vpop.xlane.xlu0 %40 }
  0x9b   :  { %v28_v22 = vrot.slane %v27_v20, 2  ;;  %v42_v23 = vrot.slane %v41_v21, 4 }
  0x9d   :  { %v43_v24 = vmax.f32 %v41_v21, %v42_v23  ;;  %v29_v25 = vmin.f32 %v27_v20, %v28_v22 }
  0x9f   :  { %v44_v26 = vrot.slane %v43_v24, 2  ;;  %v30_v27 = vrot.slane %v29_v25, 1 }
  0xa1   :  { %v45_v28 = vmax.f32 %v43_v24, %v44_v26  ;;  %v31_v29 = vmin.f32 %v29_v25, %v30_v27 }
  0xa3   :  { %65 = vpush %v31_v29  ;;  %v46_v30 = vrot.slane %v45_v28, 1 }
  0xa5   :  { %v47_v31 = vmax.f32 %v45_v28, %v46_v30 }
  0xa7   :  { %67 = vpush %v47_v31 }
  0xd4   :  { %s66_s0 = spop %65 }
  0xd5   :  { %v53_v34 = vstv %s66_s0 }
  0xd6   :  { %v54_v35 = vsub.f32 %v8_v0, %v53_v34  ;;  %v55_v36 = vsub.f32 %v9_v1, %v53_v34 }
  0xd8   :  { %s68_s10 = spop %67 }
  0xd9   :  { %s49_s11 = ssub.f32 %s68_s10, %s66_s0 }
  0xdb   :  { %v50_v32 = vstv %s49_s11 }
  0xdc   :  { %73 = vrcp.f32 %v50_v32 }
  0xe6   :  { %v74_v33 = vpop.eup %73 }
  0xe7   :  { %69 = vpush %v74_v33 }
 0x118   :  { %s70_s12 = spop %69 }
 0x119   :  { %v56_v37 = vstv %s70_s12 }
 0x11a   :  { %v57_v38 = vmul.f32 %v56_v37, %v54_v35  ;;  %v58_v39 = vmul.f32 %v56_v37, %v55_v36 }
 0x11c   :  { %59 = vst [vmem:[%s98_s1] sm:$0xff] %v57_v38  ;;  %60 = vst [vmem:[%s98_s1 + $0x8] sm:$0xff] %v58_v39 }

</bundles_post_ra>
